<compile_context>
chip_gen: v7x
topology: tpu7x:2x2x1
jax: 0.10.0
libtpu: 0.0.40
codegen_flags: <defaults>
</compile_context>

<pallas_src>
import jax
import jax.numpy as jnp
from jax.experimental import pallas as pl
from jax.experimental.pallas import tpu as pltpu

# ----- module hyper-parameters (from LARA/model.py) -----
ATTR_NUM = 18
ATTR_DICT_SIZE = 2 * ATTR_NUM          # 36
ATTR_PRESENT_DIM = 5
HIDDEN_DIM = 100
USER_EMB_DIM = ATTR_NUM                # 18
IN_DIM = ATTR_NUM * ATTR_PRESENT_DIM + USER_EMB_DIM   # 108

# ----- padded kernel dimensions -----
XP = 128     # kernel input lanes:  [0:18]=attribute ids, [18:36]=user_emb, rest 0
HP = 128     # padded hidden dim
OP = 128     # padded output dim (keep output lane-dense -> unmasked vst)
EXP = 768    # padded one-hot width: 18 positions * 36 values = 648 -> 768
TILE_B_MAX = 512   # batch tile: multiple of 256, sized for v7x's 64 MiB VMEM


def _round_up(x, m):
    return (x + m - 1) // m * m


def _pad2(a, rows, cols, dtype):
    return jnp.pad(a, ((0, rows - a.shape[0]), (0, cols - a.shape[1]))).astype(dtype)


# ----- Pallas kernel: fused embedding-lookup + 3-layer MLP (tanh/tanh/sigmoid) -----
def _disc_kernel(x_ref, r_ref, vmod_ref, t1_ref, w1u_ref, b1_ref,
                 w2_ref, b2_ref, w3_ref, b3_ref, o_ref, h1_ref, h2_ref):
    x = x_ref[...]                                                   # [TB, 128] bf16

    # Embedding gather as a one-hot matmul:
    #   ids_exp[b, 36*j + v] = attribute_id[b, j]   (exact small integers)
    ids_exp = jnp.dot(x, r_ref[...], preferred_element_type=jnp.float32)   # [TB, 768]
    onehot = jnp.where(ids_exp == vmod_ref[...], 1.0, 0.0).astype(jnp.bfloat16)

    # layer 1: attr part via pre-contracted (emb @ W1_attr) table + user part
    h1 = jnp.dot(onehot, t1_ref[...], preferred_element_type=jnp.float32)
    h1 = h1 + jnp.dot(x, w1u_ref[...], preferred_element_type=jnp.float32)
    h1_ref[...] = jnp.tanh(h1 + b1_ref[...])

    # layer 2
    h2_ref[...] = jnp.tanh(
        jnp.dot(h1_ref[...].astype(jnp.bfloat16), w2_ref[...],
                preferred_element_type=jnp.float32) + b2_ref[...])

    # layer 3 + sigmoid
    logits = jnp.dot(h2_ref[...].astype(jnp.bfloat16), w3_ref[...],
                     preferred_element_type=jnp.float32) + b3_ref[...]
    o_ref[...] = jax.nn.sigmoid(logits)


@jax.jit
def discriminator_forward(attribute_id, user_emb, params):
    """attribute_id: int [B, ATTR_NUM]; user_emb: float [B, USER_EMB_DIM]."""
    emb = params["emb"].astype(jnp.float32)        # [36, 5]
    w1, b1 = params["w1"], params["b1"]            # [108,100], [100]
    w2, b2 = params["w2"], params["b2"]            # [100,100], [100]
    w3, b3 = params["w3"], params["b3"]            # [100, 18], [18]

    B = attribute_id.shape[0]
    tile_b = TILE_B_MAX if B >= TILE_B_MAX else _round_up(B, 8)
    bp = _round_up(B, tile_b)
    grid = (bp // tile_b,)

    # ---- single fused/padded input buffer: [ids | user_emb | 0] -> bf16 ----
    x = jnp.concatenate(
        [attribute_id.astype(jnp.float32), user_emb.astype(jnp.float32)], axis=1
    )                                                              # [B, 36]
    x_p = _pad2(x, bp, XP, jnp.bfloat16)                           # [bp, 128]

    # ---- constant one-hot machinery (tiny; built once per call) ----
    col = jnp.arange(EXP)
    valid = col < ATTR_NUM * ATTR_DICT_SIZE
    pos = col // ATTR_DICT_SIZE                 # which attribute position
    val = col % ATTR_DICT_SIZE                  # which dictionary value
    row = jnp.arange(XP)[:, None]
    r_mat = jnp.where((row == pos[None, :]) & valid[None, :], 1.0, 0.0
                      ).astype(jnp.bfloat16)                       # [128, 768]
    vmod = jnp.where(valid, val, -1).astype(jnp.float32)[None, :]  # [1, 768]

    # pre-contract embedding table with attribute slice of W1:
    #   t1[36*j + v, :] = emb[v, :] @ w1[5j:5j+5, :]
    w1a = w1[: ATTR_NUM * ATTR_PRESENT_DIM].reshape(
        ATTR_NUM, ATTR_PRESENT_DIM, HIDDEN_DIM)
    t1 = jnp.einsum("vd,jdh->jvh", emb, w1a).reshape(
        ATTR_NUM * ATTR_DICT_SIZE, HIDDEN_DIM)                     # [648, 100]
    t1_p = _pad2(t1, EXP, HP, jnp.bfloat16)                        # [768, 128]

    # user slice of W1, placed at rows 18..35 to line up with x's layout
    w1u = w1[ATTR_NUM * ATTR_PRESENT_DIM:]                         # [18, 100]
    w1u_p = (jnp.zeros((XP, HP), jnp.float32)
             .at[ATTR_NUM:2 * ATTR_NUM, :HIDDEN_DIM].set(w1u)
             .astype(jnp.bfloat16))                                # [128, 128]

    b1_p = _pad2(b1[None, :], 1, HP, jnp.float32)
    w2_p = _pad2(w2, HP, HP, jnp.bfloat16)
    b2_p = _pad2(b2[None, :], 1, HP, jnp.float32)
    w3_p = _pad2(w3, HP, OP, jnp.bfloat16)
    b3_p = _pad2(b3[None, :], 1, OP, jnp.float32)

    def batch_spec(shape):
        return pl.BlockSpec(shape, lambda i: (i, 0))

    def const_spec(shape):
        return pl.BlockSpec(shape, lambda i: (0, 0))   # VMEM-resident across grid

    out_p = pl.pallas_call(
        _disc_kernel,
        out_shape=jax.ShapeDtypeStruct((bp, OP), jnp.float32),
        grid=grid,
        in_specs=[
            batch_spec((tile_b, XP)),   # x (ids | user)
            const_spec((XP, EXP)),      # one-hot expansion matrix
            const_spec((1, EXP)),       # value pattern for one-hot comparison
            const_spec((EXP, HP)),      # pre-contracted embedding x W1_attr
            const_spec((XP, HP)),       # W1_user
            const_spec((1, HP)),        # b1
            const_spec((HP, HP)),       # W2
            const_spec((1, HP)),        # b2
            const_spec((HP, OP)),       # W3
            const_spec((1, OP)),        # b3
        ],
        out_specs=batch_spec((tile_b, OP)),
        scratch_shapes=[
            pltpu.VMEM((tile_b, HP), jnp.float32),   # h1
            pltpu.VMEM((tile_b, HP), jnp.float32),   # h2
        ],
        compiler_params=pltpu.CompilerParams(
            dimension_semantics=("parallel",),
            vmem_limit_bytes=32 * 1024 * 1024,
        ),
    )(x_p, r_mat, vmod, t1_p, w1u_p, b1_p, w2_p, b2_p, w3_p, b3_p)

    return out_p[:B, :USER_EMB_DIM]


def init_params(key):
    """Deterministic xavier-normal-style init matching the module's shapes."""
    ks = jax.random.split(key, 7)

    def xavier(k, shape, fan_in, fan_out):
        std = (2.0 / (fan_in + fan_out)) ** 0.5
        return std * jax.random.normal(k, shape, dtype=jnp.float32)

    return {
        "emb": xavier(ks[0], (ATTR_DICT_SIZE, ATTR_PRESENT_DIM),
                      ATTR_DICT_SIZE, ATTR_PRESENT_DIM),
        # stored as [in, out] (transposed relative to torch's [out, in])
        "w1": xavier(ks[1], (IN_DIM, HIDDEN_DIM), IN_DIM, HIDDEN_DIM),
        "b1": xavier(ks[2], (HIDDEN_DIM,), 1, HIDDEN_DIM),
        "w2": xavier(ks[3], (HIDDEN_DIM, HIDDEN_DIM), HIDDEN_DIM, HIDDEN_DIM),
        "b2": xavier(ks[4], (HIDDEN_DIM,), 1, HIDDEN_DIM),
        "w3": xavier(ks[5], (HIDDEN_DIM, USER_EMB_DIM), HIDDEN_DIM, USER_EMB_DIM),
        "b3": xavier(ks[6], (USER_EMB_DIM,), 1, USER_EMB_DIM),
    }


def reference_forward(attribute_id, user_emb, params):
    attr_present = jnp.take(params["emb"], attribute_id.astype(jnp.int32), axis=0)
    attr_feature = attr_present.reshape(attribute_id.shape[0], -1)
    x = jnp.concatenate([attr_feature, user_emb.astype(jnp.float32)], axis=1)
    h1 = jnp.tanh(x @ params["w1"] + params["b1"])
    h2 = jnp.tanh(h1 @ params["w2"] + params["b2"])
    return jax.nn.sigmoid(h2 @ params["w3"] + params["b3"])


if __name__ == "__main__":
    key = jax.random.PRNGKey(0)
    k_param, k_ids, k_emb = jax.random.split(key, 3)

    params = init_params(k_param)

    B = 4
    attribute_id = jax.random.randint(
        k_ids, (B, ATTR_NUM), minval=0, maxval=ATTR_DICT_SIZE, dtype=jnp.int32
    )
    user_emb = jax.random.normal(k_emb, (B, USER_EMB_DIM), dtype=jnp.float32)

    y = jax.block_until_ready(discriminator_forward(attribute_id, user_emb, params))
    y_ref = reference_forward(attribute_id, user_emb, params)

    assert y.shape == (B, USER_EMB_DIM)
    max_err = float(jnp.max(jnp.abs(y - y_ref)))
    assert jnp.allclose(y, y_ref, atol=1e-2, rtol=1e-2), (
        f"mismatch vs reference, max abs diff = {max_err}")

    print("KERNEL_OK")
</pallas_src>

<mosaic_0001>
module attributes {stable_mosaic.version = 11 : i64} {
  func.func @_disc_kernel(%arg0: i32, %arg1: memref<8x128xbf16, #tpu.memory_space<vmem>>, %arg2: memref<128x768xbf16, #tpu.memory_space<vmem>>, %arg3: memref<1x768xf32, #tpu.memory_space<vmem>>, %arg4: memref<768x128xbf16, #tpu.memory_space<vmem>>, %arg5: memref<128x128xbf16, #tpu.memory_space<vmem>>, %arg6: memref<1x128xf32, #tpu.memory_space<vmem>>, %arg7: memref<128x128xbf16, #tpu.memory_space<vmem>>, %arg8: memref<1x128xf32, #tpu.memory_space<vmem>>, %arg9: memref<128x128xbf16, #tpu.memory_space<vmem>>, %arg10: memref<1x128xf32, #tpu.memory_space<vmem>>, %arg11: memref<8x128xf32, #tpu.memory_space<vmem>>, %arg12: memref<8x128xf32, #tpu.memory_space<vmem>>, %arg13: memref<8x128xf32, #tpu.memory_space<vmem>>) attributes {dimension_semantics = [#tpu.dimension_semantics<parallel>], iteration_bounds = array<i64: 1>, scalar_prefetch = 0 : i64, scratch_operands = 2 : i64, tpu.core_type = #tpu.core_type<tc>, window_params = [{transform_indices = @transform_0, window_bounds = array<i64: 8, 128>}, {pipeline_mode = #tpu.pipeline_mode<synchronous>, transform_indices = @transform_1, window_bounds = array<i64: 128, 768>}, {pipeline_mode = #tpu.pipeline_mode<synchronous>, transform_indices = @transform_2, window_bounds = array<i64: 1, 768>}, {pipeline_mode = #tpu.pipeline_mode<synchronous>, transform_indices = @transform_3, window_bounds = array<i64: 768, 128>}, {pipeline_mode = #tpu.pipeline_mode<synchronous>, transform_indices = @transform_4, window_bounds = array<i64: 128, 128>}, {pipeline_mode = #tpu.pipeline_mode<synchronous>, transform_indices = @transform_5, window_bounds = array<i64: 1, 128>}, {pipeline_mode = #tpu.pipeline_mode<synchronous>, transform_indices = @transform_6, window_bounds = array<i64: 128, 128>}, {pipeline_mode = #tpu.pipeline_mode<synchronous>, transform_indices = @transform_7, window_bounds = array<i64: 1, 128>}, {pipeline_mode = #tpu.pipeline_mode<synchronous>, transform_indices = @transform_8, window_bounds = array<i64: 128, 128>}, {pipeline_mode = #tpu.pipeline_mode<synchronous>, transform_indices = @transform_9, window_bounds = array<i64: 1, 128>}, {transform_indices = @transform_10, window_bounds = array<i64: 8, 128>}]} {
    %c0 = arith.constant 0 : index
    %c0_0 = arith.constant 0 : index
    %0 = vector.load %arg1[%c0, %c0_0] : memref<8x128xbf16, #tpu.memory_space<vmem>>, vector<8x128xbf16>
    %c0_1 = arith.constant 0 : index
    %c0_2 = arith.constant 0 : index
    %1 = vector.load %arg2[%c0_1, %c0_2] : memref<128x768xbf16, #tpu.memory_space<vmem>>, vector<128x768xbf16>
    %cst = arith.constant dense<0.000000e+00> : vector<8x768xf32>
    %2 = tpu.matmul %0, %1, %cst {dimension_numbers = #tpu.dot_dimension_numbers<[1], [0], [0], [1], [0, 0, 1, 1], [], []>} : vector<8x128xbf16>, vector<128x768xbf16>, vector<8x768xf32> -> vector<8x768xf32>
    %c0_3 = arith.constant 0 : index
    %c0_4 = arith.constant 0 : index
    %3 = vector.load %arg3[%c0_3, %c0_4] : memref<1x768xf32, #tpu.memory_space<vmem>>, vector<1x768xf32>
    %4 = vector.broadcast %3 : vector<1x768xf32> to vector<8x768xf32>
    %5 = arith.cmpf oeq, %2, %4 : vector<8x768xf32>
    %cst_5 = arith.constant 1.000000e+00 : f32
    %cst_6 = arith.constant 0.000000e+00 : f32
    %6 = vector.broadcast %cst_5 : f32 to vector<8x768xf32>
    %7 = vector.broadcast %cst_6 : f32 to vector<8x768xf32>
    %8 = arith.select %5, %6, %7 : vector<8x768xi1>, vector<8x768xf32>
    %9 = arith.truncf %8 : vector<8x768xf32> to vector<8x768xbf16>
    %c0_7 = arith.constant 0 : index
    %c0_8 = arith.constant 0 : index
    %10 = vector.load %arg4[%c0_7, %c0_8] : memref<768x128xbf16, #tpu.memory_space<vmem>>, vector<768x128xbf16>
    %cst_9 = arith.constant dense<0.000000e+00> : vector<8x128xf32>
    %11 = tpu.matmul %9, %10, %cst_9 {dimension_numbers = #tpu.dot_dimension_numbers<[1], [0], [0], [1], [0, 0, 1, 1], [], []>} : vector<8x768xbf16>, vector<768x128xbf16>, vector<8x128xf32> -> vector<8x128xf32>
    %c0_10 = arith.constant 0 : index
    %c0_11 = arith.constant 0 : index
    %12 = vector.load %arg5[%c0_10, %c0_11] : memref<128x128xbf16, #tpu.memory_space<vmem>>, vector<128x128xbf16>
    %cst_12 = arith.constant dense<0.000000e+00> : vector<8x128xf32>
    %13 = tpu.matmul %0, %12, %cst_12 {dimension_numbers = #tpu.dot_dimension_numbers<[1], [0], [0], [1], [0, 0, 1, 1], [], []>} : vector<8x128xbf16>, vector<128x128xbf16>, vector<8x128xf32> -> vector<8x128xf32>
    %14 = arith.addf %11, %13 : vector<8x128xf32>
    %c0_13 = arith.constant 0 : index
    %c0_14 = arith.constant 0 : index
    %15 = vector.load %arg6[%c0_13, %c0_14] : memref<1x128xf32, #tpu.memory_space<vmem>>, vector<1x128xf32>
    %16 = vector.broadcast %15 : vector<1x128xf32> to vector<8x128xf32>
    %17 = arith.addf %14, %16 : vector<8x128xf32>
    %18 = math.tanh %17 : vector<8x128xf32>
    %c0_15 = arith.constant 0 : index
    %c0_16 = arith.constant 0 : index
    %19 = vector.load %arg12[%c0_15, %c0_16] : memref<8x128xf32, #tpu.memory_space<vmem>>, vector<8x128xf32>
    tpu.vector_store %arg12[%c0_15, %c0_16], %18 {strides = array<i32>} : memref<8x128xf32, #tpu.memory_space<vmem>>, vector<8x128xf32>,
    %c0_17 = arith.constant 0 : index
    %c0_18 = arith.constant 0 : index
    %20 = vector.load %arg12[%c0_17, %c0_18] : memref<8x128xf32, #tpu.memory_space<vmem>>, vector<8x128xf32>
    %21 = arith.truncf %20 : vector<8x128xf32> to vector<8x128xbf16>
    %c0_19 = arith.constant 0 : index
    %c0_20 = arith.constant 0 : index
    %22 = vector.load %arg7[%c0_19, %c0_20] : memref<128x128xbf16, #tpu.memory_space<vmem>>, vector<128x128xbf16>
    %cst_21 = arith.constant dense<0.000000e+00> : vector<8x128xf32>
    %23 = tpu.matmul %21, %22, %cst_21 {dimension_numbers = #tpu.dot_dimension_numbers<[1], [0], [0], [1], [0, 0, 1, 1], [], []>} : vector<8x128xbf16>, vector<128x128xbf16>, vector<8x128xf32> -> vector<8x128xf32>
    %c0_22 = arith.constant 0 : index
    %c0_23 = arith.constant 0 : index
    %24 = vector.load %arg8[%c0_22, %c0_23] : memref<1x128xf32, #tpu.memory_space<vmem>>, vector<1x128xf32>
    %25 = vector.broadcast %24 : vector<1x128xf32> to vector<8x128xf32>
    %26 = arith.addf %23, %25 : vector<8x128xf32>
    %27 = math.tanh %26 : vector<8x128xf32>
    %c0_24 = arith.constant 0 : index
    %c0_25 = arith.constant 0 : index
    %28 = vector.load %arg13[%c0_24, %c0_25] : memref<8x128xf32, #tpu.memory_space<vmem>>, vector<8x128xf32>
    tpu.vector_store %arg13[%c0_24, %c0_25], %27 {strides = array<i32>} : memref<8x128xf32, #tpu.memory_space<vmem>>, vector<8x128xf32>,
    %c0_26 = arith.constant 0 : index
    %c0_27 = arith.constant 0 : index
    %29 = vector.load %arg13[%c0_26, %c0_27] : memref<8x128xf32, #tpu.memory_space<vmem>>, vector<8x128xf32>
    %30 = arith.truncf %29 : vector<8x128xf32> to vector<8x128xbf16>
    %c0_28 = arith.constant 0 : index
    %c0_29 = arith.constant 0 : index
    %31 = vector.load %arg9[%c0_28, %c0_29] : memref<128x128xbf16, #tpu.memory_space<vmem>>, vector<128x128xbf16>
    %cst_30 = arith.constant dense<0.000000e+00> : vector<8x128xf32>
    %32 = tpu.matmul %30, %31, %cst_30 {dimension_numbers = #tpu.dot_dimension_numbers<[1], [0], [0], [1], [0, 0, 1, 1], [], []>} : vector<8x128xbf16>, vector<128x128xbf16>, vector<8x128xf32> -> vector<8x128xf32>
    %c0_31 = arith.constant 0 : index
    %c0_32 = arith.constant 0 : index
    %33 = vector.load %arg10[%c0_31, %c0_32] : memref<1x128xf32, #tpu.memory_space<vmem>>, vector<1x128xf32>
    %34 = vector.broadcast %33 : vector<1x128xf32> to vector<8x128xf32>
    %35 = arith.addf %32, %34 : vector<8x128xf32>
    %36 = arith.negf %35 : vector<8x128xf32>
    %37 = math.exp %36 : vector<8x128xf32>
    %cst_33 = arith.constant 1.000000e+00 : f32
    %38 = vector.broadcast %cst_33 : f32 to vector<8x128xf32>
    %39 = arith.addf %38, %37 : vector<8x128xf32>
    %40 = arith.divf %38, %39 : vector<8x128xf32>
    %c0_34 = arith.constant 0 : index
    %c0_35 = arith.constant 0 : index
    %41 = vector.load %arg11[%c0_34, %c0_35] : memref<8x128xf32, #tpu.memory_space<vmem>>, vector<8x128xf32>
    tpu.vector_store %arg11[%c0_34, %c0_35], %40 {strides = array<i32>} : memref<8x128xf32, #tpu.memory_space<vmem>>, vector<8x128xf32>,
    return
  }
  func.func @transform_0(%arg0: i32) -> (i32, i32) {
    %c0_i32 = arith.constant 0 : i32
    %c0_i32_0 = arith.constant 0 : i32
    return %arg0, %c0_i32 : i32, i32
  }
  func.func @transform_1(%arg0: i32) -> (i32, i32) {
    %c0_i32 = arith.constant 0 : i32
    %c0_i32_0 = arith.constant 0 : i32
    %c0_i32_1 = arith.constant 0 : i32
    return %c0_i32, %c0_i32_0 : i32, i32
  }
  func.func @transform_2(%arg0: i32) -> (i32, i32) {
    %c0_i32 = arith.constant 0 : i32
    %c0_i32_0 = arith.constant 0 : i32
    %c0_i32_1 = arith.constant 0 : i32
    return %c0_i32, %c0_i32_0 : i32, i32
  }
  func.func @transform_3(%arg0: i32) -> (i32, i32) {
    %c0_i32 = arith.constant 0 : i32
    %c0_i32_0 = arith.constant 0 : i32
    %c0_i32_1 = arith.constant 0 : i32
    return %c0_i32, %c0_i32_0 : i32, i32
  }
  func.func @transform_4(%arg0: i32) -> (i32, i32) {
    %c0_i32 = arith.constant 0 : i32
    %c0_i32_0 = arith.constant 0 : i32
    %c0_i32_1 = arith.constant 0 : i32
    return %c0_i32, %c0_i32_0 : i32, i32
  }
  func.func @transform_5(%arg0: i32) -> (i32, i32) {
    %c0_i32 = arith.constant 0 : i32
    %c0_i32_0 = arith.constant 0 : i32
    %c0_i32_1 = arith.constant 0 : i32
    return %c0_i32, %c0_i32_0 : i32, i32
  }
  func.func @transform_6(%arg0: i32) -> (i32, i32) {
    %c0_i32 = arith.constant 0 : i32
    %c0_i32_0 = arith.constant 0 : i32
    %c0_i32_1 = arith.constant 0 : i32
    return %c0_i32, %c0_i32_0 : i32, i32
  }
  func.func @transform_7(%arg0: i32) -> (i32, i32) {
    %c0_i32 = arith.constant 0 : i32
    %c0_i32_0 = arith.constant 0 : i32
    %c0_i32_1 = arith.constant 0 : i32
    return %c0_i32, %c0_i32_0 : i32, i32
  }
  func.func @transform_8(%arg0: i32) -> (i32, i32) {
    %c0_i32 = arith.constant 0 : i32
    %c0_i32_0 = arith.constant 0 : i32
    %c0_i32_1 = arith.constant 0 : i32
    return %c0_i32, %c0_i32_0 : i32, i32
  }
  func.func @transform_9(%arg0: i32) -> (i32, i32) {
    %c0_i32 = arith.constant 0 : i32
    %c0_i32_0 = arith.constant 0 : i32
    %c0_i32_1 = arith.constant 0 : i32
    return %c0_i32, %c0_i32_0 : i32, i32
  }
  func.func @transform_10(%arg0: i32) -> (i32, i32) {
    %c0_i32 = arith.constant 0 : i32
    %c0_i32_0 = arith.constant 0 : i32
    return %arg0, %c0_i32 : i32, i32
  }
}

</mosaic_0001>

<bundles_post_ra>
// kernel: discriminator_forward.1
= control target key start
LH: loop header
LB: loop body
LE: loop exit
PB: predicated region body
PF: predicated region fallthrough
CT: control target
= control target key end

     0   :  { %v1800_v1 = vmov 0   ;;  %v1801_v38 = vmov 0.0   ;;  %vm1802_vm0 = vmmov 0   ;;  %s2290_s1 = inlined_call_operand.vmem [shape: bf16[128,768], index: 1, kind: input, shape index: {}]   ;;  %s2291_s0 = inlined_call_operand.vmem [shape: bf16[8,128], index: 0, kind: input, shape index: {}]   ;;  %s2292_s4 = inlined_call_operand.vmem [shape: bf16[128,128], index: 4, kind: input, shape index: {}]   ;;  %s2293_s3 = inlined_call_operand.vmem [shape: bf16[768,128], index: 3, kind: input, shape index: {}]   ;;  %s2294_s2 = inlined_call_operand.vmem [shape: f32[1,768], index: 2, kind: input, shape index: {}]   ;;  %s2295_s6 = inlined_call_operand.vmem [shape: bf16[128,128], index: 6, kind: input, shape index: {}]   ;;  %s2296_s8 = inlined_call_operand.vmem [shape: bf16[128,128], index: 8, kind: input, shape index: {}]   ;;  %s2297_s5 = inlined_call_operand.vmem [shape: f32[1,128], index: 5, kind: input, shape index: {}]   ;;  %s2298_s7 = inlined_call_operand.vmem [shape: f32[1,128], index: 7, kind: input, shape index: {}]   ;;  %s2299_s9 = inlined_call_operand.vmem [shape: f32[1,128], index: 9, kind: input, shape index: {}]   ;;  %s2300_s10 = inlined_call_operand.vmem [shape: f32[8,128], index: 10, kind: output, shape index: {}]  }
   0x1   :  { %v1648_v0 = vld [vmem:[%s2290_s1 + $0x4] ss:$24 sps:$4 sm:$0xff]   ;;  %357 = vmatprep.mubr.bf16.mxu0 %v1800_v1  ;;  %398 = vmatprep.mubr.bf16.mxu1 %v1800_v1  ;;  %v1650_v2 = vld [vmem:[%s2290_s1] ss:$24 sps:$4 sm:$0xff]   ;;  %v1654_v5 = vld [vmem:[%s2290_s1 + $0x34] ss:$24 sps:$4 sm:$0xff]  }
   0x2   :  { %325 = vmatprep.subr.bf16.mxu0 %v1648_v0  ;;  %v1651_v3 = vld [vmem:[%s2290_s1 + $0xc] ss:$24 sps:$4 sm:$0xff]   ;;  %v1653_v4 = vld [vmem:[%s2290_s1 + $0x8] ss:$24 sps:$4 sm:$0xff]   ;;  %v1657_v7 = vld [vmem:[%s2290_s1 + $0x3c] ss:$24 sps:$4 sm:$0xff]  }
   0x3   :  { %326 = vmatpush1.bf16.msra.mxu0 %v1650_v2  ;;  %v1656_v6 = vld [vmem:[%s2290_s1 + $0x30] ss:$24 sps:$4 sm:$0xff]   ;;  %366 = vmatprep.subr.bf16.mxu1 %v1651_v3  ;;  %v1660_v9 = vld [vmem:[%s2290_s1 + $0x64] ss:$24 sps:$4 sm:$0xff]   ;;  %v1662_v10 = vld [vmem:[%s2290_s1 + $0x60] ss:$24 sps:$4 sm:$0xff]  }
   0x4   :  { %367 = vmatpush1.bf16.msra.mxu1 %v1653_v4  ;;  %327 = vmatprep.subr.bf16.mxu0 %v1654_v5  ;;  %v1659_v8 = vld [vmem:[%s2290_s1 + $0x38] ss:$24 sps:$4 sm:$0xff]   ;;  %v1663_v11 = vld [vmem:[%s2290_s1 + $0x6c] ss:$24 sps:$4 sm:$0xff]   ;;  %v1665_v13 = vld [vmem:[%s2290_s1 + $0x68] ss:$24 sps:$4 sm:$0xff]  }
   0x5   :  { %368 = vmatprep.subr.bf16.mxu1 %v1657_v7  ;;  %v1666_v12 = vld [vmem:[%s2290_s1 + $0x94] ss:$24 sps:$4 sm:$0xff]   ;;  %v1668_v15 = vld [vmem:[%s2290_s1 + $0x90] ss:$24 sps:$4 sm:$0xff]   ;;  %v1672_v16 = vld [vmem:[%s2290_s1 + $0xc4] ss:$24 sps:$4 sm:$0xff]  }
   0x6   :  { %v1669_v14 = vld [vmem:[%s2290_s1 + $0x9c] ss:$24 sps:$4 sm:$0xff]   ;;  %v1671_v17 = vld [vmem:[%s2290_s1 + $0x98] ss:$24 sps:$4 sm:$0xff]   ;;  %v1675_v18 = vld [vmem:[%s2290_s1 + $0xcc] ss:$24 sps:$4 sm:$0xff]  }
   0x7   :  { %328 = vmatpush1.bf16.msra.mxu0 %v1656_v6  ;;  %v1674_v19 = vld [vmem:[%s2290_s1 + $0xc0] ss:$24 sps:$4 sm:$0xff]   ;;  %v1678_v20 = vld [vmem:[%s2290_s1 + $0xf4] ss:$24 sps:$4 sm:$0xff]   ;;  %v1680_v23 = vld [vmem:[%s2290_s1 + $0xf0] ss:$24 sps:$4 sm:$0xff]  }
   0x8   :  { %329 = vmatprep.subr.bf16.mxu0 %v1660_v9  ;;  %369 = vmatpush1.bf16.msra.mxu1 %v1659_v8  ;;  %v1677_v21 = vld [vmem:[%s2290_s1 + $0xc8] ss:$24 sps:$4 sm:$0xff]   ;;  %v1681_v22 = vld [vmem:[%s2290_s1 + $0xfc] ss:$24 sps:$4 sm:$0xff]   ;;  %v1683_v25 = vld [vmem:[%s2290_s1 + $0xf8] ss:$24 sps:$4 sm:$0xff]  }
   0x9   :  { %370 = vmatprep.subr.bf16.mxu1 %v1663_v11  ;;  %v1684_v24 = vld [vmem:[%s2290_s1 + $0x124] ss:$24 sps:$4 sm:$0xff]   ;;  %v1686_v27 = vld [vmem:[%s2290_s1 + $0x120] ss:$24 sps:$4 sm:$0xff]   ;;  %v1690_v28 = vld [vmem:[%s2290_s1 + $0x154] ss:$24 sps:$4 sm:$0xff]  }
   0xa   :  { %v1687_v26 = vld [vmem:[%s2290_s1 + $0x12c] ss:$24 sps:$4 sm:$0xff]   ;;  %v1689_v29 = vld [vmem:[%s2290_s1 + $0x128] ss:$24 sps:$4 sm:$0xff]   ;;  %v1693_v30 = vld [vmem:[%s2290_s1 + $0x15c] ss:$24 sps:$4 sm:$0xff]  }
   0xb   :  { %330 = vmatpush1.bf16.msra.mxu0 %v1662_v10  ;;  %v1692_v31 = vld [vmem:[%s2290_s1 + $0x150] ss:$24 sps:$4 sm:$0xff]   ;;  %v1698_v32 = vld [vmem:[%s2290_s1 + $0x14] ss:$24 sps:$4 sm:$0xff]   ;;  %v1963_v34 = vld [vmem:[%s2291_s0] sm:$0xf] }
   0xc   :  { %331 = vmatprep.subr.bf16.mxu0 %v1666_v12  ;;  %371 = vmatpush1.bf16.msra.mxu1 %v1665_v13  ;;  %v1695_v33 = vld [vmem:[%s2290_s1 + $0x158] ss:$24 sps:$4 sm:$0xff]   ;;  %v1701_v36 = vld [vmem:[%s2290_s1 + $0x44] ss:$24 sps:$4 sm:$0xff]   ;;  %v1704_v40 = vld [vmem:[%s2290_s1 + $0x74] ss:$24 sps:$4 sm:$0xff]  }
   0xd   :  { %372 = vmatprep.subr.bf16.mxu1 %v1669_v14  ;;  %v1696_v35 = vld [vmem:[%s2290_s1 + $0x10] ss:$24 sps:$4 sm:$0xff]   ;;  %v1720_v37 = vld [vmem:[%s2292_s4] sm:$0xff]   ;;  %v1710_v46 = vld [vmem:[%s2290_s1 + $0xd4] ss:$24 sps:$4 sm:$0xff]  }
   0xe   :  { %v1699_v39 = vld [vmem:[%s2290_s1 + $0x40] ss:$24 sps:$4 sm:$0xff]   ;;  %v1721_v41 = vld [vmem:[%s2292_s4 + $0x8] sm:$0xff]   ;;  %v1707_v43 = vld [vmem:[%s2290_s1 + $0xa4] ss:$24 sps:$4 sm:$0xff]  }
   0xf   :  { %332 = vmatpush1.bf16.msra.mxu0 %v1668_v15  ;;  %v1702_v42 = vld [vmem:[%s2290_s1 + $0x70] ss:$24 sps:$4 sm:$0xff]   ;;  %v1705_v45 = vld [vmem:[%s2290_s1 + $0xa0] ss:$24 sps:$4 sm:$0xff]   ;;  %v1713_v49 = vld [vmem:[%s2290_s1 + $0x104] ss:$24 sps:$4 sm:$0xff]  }
  0x10   :  { %333 = vmatprep.subr.bf16.mxu0 %v1672_v16  ;;  %373 = vmatpush1.bf16.msra.mxu1 %v1671_v17  ;;  %v1722_v44 = vld [vmem:[%s2292_s4 + $0x10] sm:$0xff]   ;;  %v1723_v47 = vld [vmem:[%s2292_s4 + $0x18] sm:$0xff]   ;;  %v1724_v50 = vld [vmem:[%s2292_s4 + $0x20] sm:$0xff]  }
  0x11   :  { %374 = vmatprep.subr.bf16.mxu1 %v1675_v18  ;;  %v1708_v48 = vld [vmem:[%s2290_s1 + $0xd0] ss:$24 sps:$4 sm:$0xff]   ;;  %v1711_v51 = vld [vmem:[%s2290_s1 + $0x100] ss:$24 sps:$4 sm:$0xff]   ;;  %v1716_v52 = vld [vmem:[%s2290_s1 + $0x134] ss:$24 sps:$4 sm:$0xff]  }
  0x12   :  { %v1725_v53 = vld [vmem:[%s2292_s4 + $0x28] sm:$0xff]   ;;  %v1719_v55 = vld [vmem:[%s2290_s1 + $0x164] ss:$24 sps:$4 sm:$0xff]   ;;  %v1726_v56 = vld [vmem:[%s2292_s4 + $0x30] sm:$0xff]  }
  0x13   :  { %334 = vmatpush1.bf16.msra.mxu0 %v1674_v19  ;;  %v1714_v54 = vld [vmem:[%s2290_s1 + $0x130] ss:$24 sps:$4 sm:$0xff]   ;;  %v1717_v57 = vld [vmem:[%s2290_s1 + $0x160] ss:$24 sps:$4 sm:$0xff]  }
  0x14   :  { %335 = vmatprep.subr.bf16.mxu0 %v1678_v20  ;;  %375 = vmatpush1.bf16.msra.mxu1 %v1677_v21  ;;  %v1727_v58 = vld [vmem:[%s2292_s4 + $0x38] sm:$0xff]   ;;  %v1728_v59 = vld [vmem:[%s2293_s3 + $0x40] sm:$0xff]   ;;  %v1732_v63 = vld [vmem:[%s2293_s3 + $0x48] sm:$0xff]  }
  0x15   :  { %376 = vmatprep.subr.bf16.mxu1 %v1681_v22  ;;  %v1729_v60 = vld [vmem:[%s2293_s3] sm:$0xff]   ;;  %v1733_v0 = vld [vmem:[%s2293_s3 + $0x8] sm:$0xff]   ;;  %v1736_v3 = vld [vmem:[%s2293_s3 + $0x50] sm:$0xff]  }
  0x16   :  { %v1730_v61 = vld [vmem:[%s2293_s3 + $0xc0] sm:$0xff]   ;;  %v1735_v2 = vld [vmem:[%s2293_s3 + $0x88] sm:$0xff]   ;;  %v1738_v4 = vld [vmem:[%s2293_s3 + $0xd0] sm:$0xff]  }
  0x17   :  { %336 = vmatpush1.bf16.msra.mxu0 %v1680_v23  ;;  %v1731_v62 = vld [vmem:[%s2293_s3 + $0x80] sm:$0xff]   ;;  %v1737_v5 = vld [vmem:[%s2293_s3 + $0x10] sm:$0xff]   ;;  %v1740_v6 = vld [vmem:[%s2293_s3 + $0x58] sm:$0xff]  }
  0x18   :  { %337 = vmatprep.subr.bf16.mxu0 %v1684_v24  ;;  %377 = vmatpush1.bf16.msra.mxu1 %v1683_v25  ;;  %v1739_v7 = vld [vmem:[%s2293_s3 + $0x90] sm:$0xff]   ;;  %v1742_v8 = vld [vmem:[%s2293_s3 + $0xd8] sm:$0xff]   ;;  %v1744_v10 = vld [vmem:[%s2293_s3 + $0x60] sm:$0xff]  }
  0x19   :  { %378 = vmatprep.subr.bf16.mxu1 %v1687_v26  ;;  %v1741_v9 = vld [vmem:[%s2293_s3 + $0x18] sm:$0xff]   ;;  %v1746_v12 = vld [vmem:[%s2293_s3 + $0xe0] sm:$0xff]   ;;  %v1748_v14 = vld [vmem:[%s2293_s3 + $0x68] sm:$0xff]  }
  0x1a   :  { %v1743_v11 = vld [vmem:[%s2293_s3 + $0x98] sm:$0xff]   ;;  %v1745_v13 = vld [vmem:[%s2293_s3 + $0x20] sm:$0xff]   ;;  %v1750_v16 = vld [vmem:[%s2293_s3 + $0xe8] sm:$0xff]  }
  0x1b   :  { %338 = vmatpush1.bf16.msra.mxu0 %v1686_v27  ;;  %v1747_v15 = vld [vmem:[%s2293_s3 + $0xa0] sm:$0xff]   ;;  %v1749_v17 = vld [vmem:[%s2293_s3 + $0x28] sm:$0xff]   ;;  %v1752_v18 = vld [vmem:[%s2293_s3 + $0x70] sm:$0xff]  }
  0x1c   :  { %339 = vmatprep.subr.bf16.mxu0 %v1690_v28  ;;  %379 = vmatpush1.bf16.msra.mxu1 %v1689_v29  ;;  %v1751_v19 = vld [vmem:[%s2293_s3 + $0xa8] sm:$0xff]   ;;  %v1754_v20 = vld [vmem:[%s2293_s3 + $0xf0] sm:$0xff]   ;;  %v1756_v23 = vld [vmem:[%s2293_s3 + $0x78] sm:$0xff]   ;;  %v450_v28 = vlaneseq }
  0x1d   :  { %380 = vmatprep.subr.bf16.mxu1 %v1693_v30  ;;  %v1753_v21 = vld [vmem:[%s2293_s3 + $0x30] sm:$0xff]   ;;  %v1757_v24 = vld [vmem:[%s2293_s3 + $0x38] sm:$0xff]   ;;  %v1760_v27 = vld [vmem:[%s2293_s3 + $0x140] sm:$0xff]  }
  0x1e   :  { %v1755_v22 = vld [vmem:[%s2293_s3 + $0xb0] sm:$0xff]   ;;  %v1758_v25 = vld [vmem:[%s2293_s3 + $0xf8] sm:$0xff]   ;;  %v2149_v29 = vshrl.u32 %v450_v28, 7 }
  0x1f   :  { %340 = vmatpush1.bf16.msra.mxu0 %v1692_v31  ;;  %v1759_v26 = vld [vmem:[%s2293_s3 + $0xb8] sm:$0xff]   ;;  %v448_v31 = vld [vmem:[%s2294_s2] sm:$0x3f] }
  0x20   :  { %407 = vmatprep.subr.bf16.mxu0 %v1698_v32  ;;  %381 = vmatpush1.bf16.msra.mxu1 %v1695_v33  ;;  %v452_v30 = vsub.s32 0, %v2149_v29  ;;  %v456_v32 = vsub.s32 1, %v2149_v29  ;;  %v460_v33 = vsub.s32 2, %v2149_v29 }
  0x21   :  { %1584 = vmatprep.subr.bf16.mxu1 %v1801_v38 }
  0x22   :  { %358 = vmatmul.mubr.bf16.vlgmr.msra.gmra.mrb[0].mxu0 %v1963_v34 }
  0x23   :  { %408 = vmatpush1.bf16.msra.mxu0 %v1696_v35  ;;  %439 = vmatprep.mubr.bf16.mxu0 %v1800_v1  ;;  %v1734_v1 = vld [vmem:[%s2293_s3 + $0xc8] sm:$0xff]   ;;  %v453_v35 = vrot.slane %v448_v31, %v452_v30 }
  0x24   :  { %399 = vmatmul.mubr.bf16.vlgmr.msra.gmra.mrb[0].mxu1 %v1963_v34  ;;  %409 = vmatprep.subr.bf16.mxu0 %v1701_v36  ;;  %v457_v36 = vrot.slane %v448_v31, %v456_v32 }
  0x25   :  { %1585 = vmatpush3.bf16.msra.mxu1 %v1720_v37  ;;  %1600 = vmatprep.mubr.msk.bf16.mxu1 %vm1802_vm0, %v1801_v38  ;;  %v461_v37 = vrot.slane %v448_v31, %v460_v33 }
  0x26   :  { %1586 = vmatprep.subr.bf16.mxu1 %v1801_v38 }
  0x27   :  { %410 = vmatpush1.bf16.msra.mxu0 %v1699_v39 }
  0x28   :  { %411 = vmatprep.subr.bf16.mxu0 %v1704_v40 }
  0x29   :  { %1587 = vmatpush3.bf16.msra.mxu1 %v1721_v41 }
  0x2a   :  { %1588 = vmatprep.subr.bf16.mxu1 %v1801_v38 }
  0x2b   :  { %412 = vmatpush1.bf16.msra.mxu0 %v1702_v42  ;;  %v1471_v42 = vld [vmem:[%s2297_s5] ss:$0 sm:$0xff] }
  0x2c   :  { %413 = vmatprep.subr.bf16.mxu0 %v1707_v43 }
  0x2d   :  { %1589 = vmatpush3.bf16.msra.mxu1 %v1722_v44 }
  0x2e   :  { %1590 = vmatprep.subr.bf16.mxu1 %v1801_v38 }
  0x2f   :  { %414 = vmatpush1.bf16.msra.mxu0 %v1705_v45  ;;  %v1761_v45 = vld [vmem:[%s2293_s3 + $0x100] sm:$0xff]  }
  0x30   :  { %415 = vmatprep.subr.bf16.mxu0 %v1710_v46 }
  0x31   :  { %1591 = vmatpush3.bf16.msra.mxu1 %v1723_v47 }
  0x32   :  { %1592 = vmatprep.subr.bf16.mxu1 %v1801_v38 }
  0x33   :  { %416 = vmatpush1.bf16.msra.mxu0 %v1708_v48  ;;  %v1762_v48 = vld [vmem:[%s2293_s3 + $0x148] sm:$0xff]  }
  0x34   :  { %417 = vmatprep.subr.bf16.mxu0 %v1713_v49  ;;  %v1803_v49 = vmov 1.0|1.0  }
  0x35   :  { %1593 = vmatpush3.bf16.msra.mxu1 %v1724_v50 }
  0x36   :  { %1594 = vmatprep.subr.bf16.mxu1 %v1801_v38 }
  0x37   :  { %418 = vmatpush1.bf16.msra.mxu0 %v1711_v51 }
  0x38   :  { %419 = vmatprep.subr.bf16.mxu0 %v1716_v52  ;;  %v1763_v52 = vld [vmem:[%s2293_s3 + $0x108] sm:$0xff]  }
  0x39   :  { %1595 = vmatpush3.bf16.msra.mxu1 %v1725_v53  ;;  %v1764_v53 = vld [vmem:[%s2293_s3 + $0x150] sm:$0xff]  }
  0x3a   :  { %1596 = vmatprep.subr.bf16.mxu1 %v1801_v38 }
  0x3b   :  { %420 = vmatpush1.bf16.msra.mxu0 %v1714_v54  ;;  %v1765_v54 = vld [vmem:[%s2293_s3 + $0x110] sm:$0xff]  }
  0x3c   :  { %421 = vmatprep.subr.bf16.mxu0 %v1719_v55  ;;  %v1766_v55 = vld [vmem:[%s2293_s3 + $0x158] sm:$0xff]  }
  0x3d   :  { %1597 = vmatpush3.bf16.msra.mxu1 %v1726_v56  ;;  %v1767_v56 = vld [vmem:[%s2293_s3 + $0x118] sm:$0xff]  }
  0x3e   :  { %1598 = vmatprep.subr.bf16.mxu1 %v1801_v38 }
  0x3f   :  { %422 = vmatpush1.bf16.msra.mxu0 %v1717_v57  ;;  %v1768_v57 = vld [vmem:[%s2293_s3 + $0x160] sm:$0xff]  }
  0x40   :  { %1500 = vmatprep.subr.bf16.mxu0 %v1728_v59  ;;  %v1770_v59 = vld [vmem:[%s2293_s3 + $0x168] sm:$0xff]  }
  0x41   :  { %1599 = vmatpush3.bf16.msra.mxu1 %v1727_v58  ;;  %v1769_v58 = vld [vmem:[%s2293_s3 + $0x120] sm:$0xff]  }
  0x42   :  { %440 = vmatmul.mubr.bf16.vlgmr.msra.gmra.mrb[4].mxu0 %v1963_v34  ;;  %1522 = vmatprep.subr.bf16.mxu1 %v1730_v61  ;;  %v1772_v61 = vld [vmem:[%s2293_s3 + $0x170] sm:$0xff]  }
  0x43   :  { %1501 = vmatpush3.bf16.msra.mxu0 %v1729_v60  ;;  %v1771_v60 = vld [vmem:[%s2293_s3 + $0x128] sm:$0xff]  }
  0x44   :  { %1601 = vmatmul.mubr.bf16.vlgmr.msra.gmra.mrb[4].mxu1 %v1963_v34  ;;  %1502 = vmatprep.subr.bf16.mxu0 %v1732_v63  ;;  %v464_v34 = vsub.s32 3, %v2149_v29  ;;  %v1773_v63 = vld [vmem:[%s2293_s3 + $0x130] sm:$0xff]  }
  0x45   :  { %1523 = vmatpush3.bf16.msra.mxu1 %v1731_v62  ;;  %v468_v62 = vsub.s32 4, %v2149_v29 }
  0x46   :  { %1524 = vmatprep.subr.bf16.mxu1 %v1734_v1  ;;  %v465_v40 = vrot.slane %v448_v31, %v464_v34  ;;  %v1774_v1 = vld [vmem:[%s2293_s3 + $0x178] sm:$0xff]  }
  0x47   :  { %1503 = vmatpush3.bf16.msra.mxu0 %v1733_v0  ;;  %v472_v0 = vsub.s32 5, %v2149_v29 }
  0x48   :  { %1504 = vmatprep.subr.bf16.mxu0 %v1736_v3 }
  0x49   :  { %1525 = vmatpush3.bf16.msra.mxu1 %v1735_v2  ;;  %v469_v2 = vrot.slane %v448_v31, %v468_v62  ;;  %v473_v3 = vrot.slane %v448_v31, %v472_v0 }
  0x4a   :  { %1526 = vmatprep.subr.bf16.mxu1 %v1738_v4  ;;  %v1775_v4 = vld [vmem:[%s2293_s3 + $0x138] sm:$0xff]  }
  0x4b   :  { %1505 = vmatpush3.bf16.msra.mxu0 %v1737_v5 }
  0x4c   :  { %1506 = vmatprep.subr.bf16.mxu0 %v1740_v6 }
  0x4d   :  { %1527 = vmatpush3.bf16.msra.mxu1 %v1739_v7 }
  0x4e   :  { %1528 = vmatprep.subr.bf16.mxu1 %v1742_v8 }
  0x4f   :  { %1507 = vmatpush3.bf16.msra.mxu0 %v1741_v9 }
  0x50   :  { %1508 = vmatprep.subr.bf16.mxu0 %v1744_v10 }
  0x51   :  { %1529 = vmatpush3.bf16.msra.mxu1 %v1743_v11 }
  0x52   :  { %1530 = vmatprep.subr.bf16.mxu1 %v1746_v12 }
  0x53   :  { %1509 = vmatpush3.bf16.msra.mxu0 %v1745_v13  ;;  %v1776_v13 = vld [vmem:[%s2295_s6] sm:$0xff]  }
  0x54   :  { %1510 = vmatprep.subr.bf16.mxu0 %v1748_v14  ;;  %v1777_v14 = vld [vmem:[%s2295_s6 + $0x8] sm:$0xff]  }
  0x55   :  { %1531 = vmatpush3.bf16.msra.mxu1 %v1747_v15  ;;  %v1778_v15 = vld [vmem:[%s2295_s6 + $0x10] sm:$0xff]  }
  0x56   :  { %1532 = vmatprep.subr.bf16.mxu1 %v1750_v16  ;;  %v1779_v16 = vld [vmem:[%s2295_s6 + $0x18] sm:$0xff]  }
  0x57   :  { %1511 = vmatpush3.bf16.msra.mxu0 %v1749_v17  ;;  %v1780_v17 = vld [vmem:[%s2295_s6 + $0x20] sm:$0xff]  }
  0x58   :  { %1512 = vmatprep.subr.bf16.mxu0 %v1752_v18  ;;  %v1781_v18 = vld [vmem:[%s2295_s6 + $0x28] sm:$0xff]  }
  0x59   :  { %1533 = vmatpush3.bf16.msra.mxu1 %v1751_v19  ;;  %v1782_v19 = vld [vmem:[%s2295_s6 + $0x30] sm:$0xff]  }
  0x5a   :  { %1534 = vmatprep.subr.bf16.mxu1 %v1754_v20  ;;  %v1783_v20 = vld [vmem:[%s2295_s6 + $0x38] sm:$0xff]  }
  0x5b   :  { %1513 = vmatpush3.bf16.msra.mxu0 %v1753_v21  ;;  %v1784_v21 = vld [vmem:[%s2296_s8] sm:$0xff]  }
  0x5c   :  { %1514 = vmatprep.subr.bf16.mxu0 %v1756_v23  ;;  %v1786_v23 = vld [vmem:[%s2296_s8 + $0x10] sm:$0xff]  }
  0x5d   :  { %1535 = vmatpush3.bf16.msra.mxu1 %v1755_v22  ;;  %v1785_v22 = vld [vmem:[%s2296_s8 + $0x8] sm:$0xff]  }
  0x5e   :  { %1536 = vmatprep.subr.bf16.mxu1 %v1758_v25 }
  0x5f   :  { %1515 = vmatpush3.bf16.msra.mxu0 %v1757_v24  ;;  %v1787_v24 = vld [vmem:[%s2296_s8 + $0x18] sm:$0xff]  }
  0x60   :  { %1544 = vmatprep.subr.bf16.mxu0 %v1760_v27 }
  0x61   :  { %1537 = vmatpush3.bf16.msra.mxu1 %v1759_v26 }
  0x62   :  { %1604 = vmatprep.subr.bf16.mxu1 %v1801_v38 }
  0xf5   :  { %v359_v39 = vpop.f32.mrb[0].mxu0 }
  0xf6   :  { %vm480_vm1 = vcmp.eq.f32.partialorder %v359_v39, %v453_v35  ;;  %v361_v41 = vpop.f32.mrb[1].mxu0 }
  0xf7   :  { %vm2158_vm2 = vmpackc.low %vm480_vm1, %vm480_vm1  ;;  %vm481_vm3 = vcmp.eq.f32.partialorder %v361_v41, %v457_v36  ;;  %v363_v43 = vpop.f32.mrb[2].mxu0  ;;  %v400_v44 = vpop.f32.mrb[0].mxu1 }
  0xf8   :  { %vm1459_vm4 = vmpackc.low %vm481_vm3, %vm481_vm3  ;;  %vm482_vm5 = vcmp.eq.f32.partialorder %v400_v44, %v461_v37  ;;  %v364_v46 = vpop.f32.mrb[3].mxu0  ;;  %v402_v47 = vpop.f32.mrb[1].mxu1 }
  0xf9   :  { %vm1465_vm6 = vmpackc.low %vm482_vm5, %vm482_vm5  ;;  %vm483_vm7 = vcmp.eq.f32.partialorder %v402_v47, %v465_v40  ;;  %1460 = vmatprep.mubr.msk.bf16.mxu0 %vm1459_vm4, %v1803_v49  ;;  %v404_v50 = vpop.f32.mrb[2].mxu1 }
  0xfa   :  { %vm1463_vm8 = vmpackc.low %vm483_vm7, %vm483_vm7  ;;  %1462 = vmatmul.mubr.msk.bf16.vlgmr.msra.gmra.mrb[8].mxu0 %vm2158_vm2, %v1803_v49  ;;  %v405_v51 = vpop.f32.mrb[3].mxu1  ;;  %v1790_v50 = vld [vmem:[%s2296_s8 + $0x30] sm:$0xff]  }
  0xfb   :  { %1464 = vmatprep.mubr.msk.bf16.mxu1 %vm1463_vm8, %v1803_v49  ;;  %1545 = vmatpush3.bf16.msra.mxu0 %v1761_v45  ;;  %v1791_v51 = vld [vmem:[%s2296_s8 + $0x38] sm:$0xff]  }
  0xfc   :  { %1466 = vmatmul.mubr.msk.bf16.vlgmr.msra.gmra.mrb[8].mxu1 %vm1465_vm6, %v1803_v49  ;;  %1546 = vmatprep.subr.bf16.mxu0 %v1762_v48  ;;  %v1788_v48 = vld [vmem:[%s2296_s8 + $0x20] sm:$0xff]  }
  0xfd   :  { %1620 = vmatprep.mubr.msk.bf16.mxu1 %vm1802_vm0, %v1801_v38  ;;  %1605 = vmatpush3.bf16.msra.mxu1 %v1776_v13 }
  0xfe   :  { %1606 = vmatprep.subr.bf16.mxu1 %v1801_v38 }
  0xff   :  { %1547 = vmatpush3.bf16.msra.mxu0 %v1763_v52  ;;  %v1472_v52 = vld [vmem:[%s2298_s7] ss:$0 sm:$0xff] }
 0x100   :  { %1548 = vmatprep.subr.bf16.mxu0 %v1764_v53 }
 0x101   :  { %1607 = vmatpush3.bf16.msra.mxu1 %v1777_v14 }
 0x102   :  { %1608 = vmatprep.subr.bf16.mxu1 %v1801_v38 }
 0x103   :  { %1549 = vmatpush3.bf16.msra.mxu0 %v1765_v54 }
 0x104   :  { %1550 = vmatprep.subr.bf16.mxu0 %v1766_v55 }
 0x105   :  { %1609 = vmatpush3.bf16.msra.mxu1 %v1778_v15 }
 0x106   :  { %1610 = vmatprep.subr.bf16.mxu1 %v1801_v38 }
 0x107   :  { %1551 = vmatpush3.bf16.msra.mxu0 %v1767_v56 }
 0x108   :  { %1552 = vmatprep.subr.bf16.mxu0 %v1768_v57 }
 0x109   :  { %1611 = vmatpush3.bf16.msra.mxu1 %v1779_v16 }
 0x10a   :  { %1612 = vmatprep.subr.bf16.mxu1 %v1801_v38 }
 0x10b   :  { %1553 = vmatpush3.bf16.msra.mxu0 %v1769_v58 }
 0x10c   :  { %1554 = vmatprep.subr.bf16.mxu0 %v1770_v59 }
 0x10d   :  { %1613 = vmatpush3.bf16.msra.mxu1 %v1780_v17 }
 0x10e   :  { %1614 = vmatprep.subr.bf16.mxu1 %v1801_v38 }
 0x10f   :  { %1555 = vmatpush3.bf16.msra.mxu0 %v1771_v60 }
 0x110   :  { %1556 = vmatprep.subr.bf16.mxu0 %v1772_v61 }
 0x111   :  { %1615 = vmatpush3.bf16.msra.mxu1 %v1781_v18 }
 0x112   :  { %1616 = vmatprep.subr.bf16.mxu1 %v1801_v38 }
 0x113   :  { %1557 = vmatpush3.bf16.msra.mxu0 %v1773_v63 }
 0x114   :  { %1558 = vmatprep.subr.bf16.mxu0 %v1774_v1 }
 0x115   :  { %v441_v5 = vpop.f32.mrb[4].mxu0  ;;  %1617 = vmatpush3.bf16.msra.mxu1 %v1782_v19 }
 0x116   :  { %vm484_vm9 = vcmp.eq.f32.partialorder %v441_v5, %v469_v2  ;;  %v443_v6 = vpop.f32.mrb[5].mxu0  ;;  %1618 = vmatprep.subr.bf16.mxu1 %v1801_v38 }
 0x117   :  { %vm485_vm10 = vcmp.eq.f32.partialorder %v443_v6, %v473_v3  ;;  %v445_v7 = vpop.f32.mrb[6].mxu0  ;;  %1559 = vmatpush3.bf16.msra.mxu0 %v1775_v4  ;;  %v692_v8 = vpop.f32.mrb[4].mxu1  ;;  %vm1469_vm12 = vmpackc.low %vm484_vm9, %vm484_vm9 }
 0x118   :  { %vm1467_vm11 = vmpackc.low %vm485_vm10, %vm485_vm10  ;;  %v446_v9 = vpop.f32.mrb[7].mxu0  ;;  %v1602_v10 = vpop.f32.mrb[5].mxu1  ;;  %1624 = vmatprep.subr.bf16.mxu0 %v1801_v38 }
 0x119   :  { %1468 = vmatprep.mubr.msk.bf16.mxu0 %vm1467_vm11, %v1803_v49  ;;  %v695_v11 = vpop.f32.mrb[6].mxu1  ;;  %1619 = vmatpush3.bf16.msra.mxu1 %v1783_v20 }
 0x11a   :  { %1470 = vmatmul.mubr.msk.bf16.vlgmr.msra.gmra.mrb[12].mxu0 %vm1469_vm12, %v1803_v49  ;;  %v1603_v12 = vpop.f32.mrb[7].mxu1  ;;  %v1789_v49 = vld [vmem:[%s2296_s8 + $0x28] sm:$0xff]  }
 0x11b   :  { %1640 = vmatprep.mubr.msk.bf16.mxu0 %vm1802_vm0, %v1801_v38  ;;  %1625 = vmatpush3.bf16.msra.mxu0 %v1784_v21 }
 0x11c   :  { %1626 = vmatprep.subr.bf16.mxu0 %v1801_v38 }
 0x11f   :  { %1627 = vmatpush3.bf16.msra.mxu0 %v1785_v22 }
 0x120   :  { %1628 = vmatprep.subr.bf16.mxu0 %v1801_v38 }
 0x123   :  { %1629 = vmatpush3.bf16.msra.mxu0 %v1786_v23 }
 0x124   :  { %1630 = vmatprep.subr.bf16.mxu0 %v1801_v38 }
 0x127   :  { %1631 = vmatpush3.bf16.msra.mxu0 %v1787_v24 }
 0x128   :  { %1632 = vmatprep.subr.bf16.mxu0 %v1801_v38 }
 0x12b   :  { %1633 = vmatpush3.bf16.msra.mxu0 %v1788_v48 }
 0x12c   :  { %1634 = vmatprep.subr.bf16.mxu0 %v1801_v38 }
 0x12f   :  { %1635 = vmatpush3.bf16.msra.mxu0 %v1789_v49 }
 0x130   :  { %1636 = vmatprep.subr.bf16.mxu0 %v1801_v38 }
 0x133   :  { %1637 = vmatpush3.bf16.msra.mxu0 %v1790_v50 }
 0x134   :  { %1638 = vmatprep.subr.bf16.mxu0 %v1801_v38  ;;  %v1481_v38 = vld [vmem:[%s2299_s9] ss:$0 sm:$0xff] }
 0x137   :  { %1639 = vmatpush3.bf16.msra.mxu0 %v1791_v51 }
 0x1cd   :  { %v1516_v25 = vpop.f32.mrb[8].mxu0 }
 0x1ce   :  { %v1517_v26 = vpop.f32.mrb[9].mxu0 }
 0x1cf   :  { %v1518_v27 = vadd.f32 %v1517_v26, %v1516_v25  ;;  %v1519_v28 = vpop.f32.mrb[10].mxu0  ;;  %v1538_v29 = vpop.f32.mrb[8].mxu1 }
 0x1d0   :  { %v1520_v30 = vpop.f32.mrb[11].mxu0  ;;  %v1539_v31 = vpop.f32.mrb[9].mxu1 }
 0x1d1   :  { %v1021_v32 = vadd.f32 %v1518_v27, %v692_v8  ;;  %v1540_v33 = vadd.f32 %v1539_v31, %v1538_v29  ;;  %v1541_v34 = vpop.f32.mrb[10].mxu1 }
 0x1d2   :  { %v1542_v35 = vpop.f32.mrb[11].mxu1 }
 0x1d3   :  { %v1061_v36 = vadd.f32 %v1540_v33, %v1021_v32 }
 0x1ed   :  { %v1560_v37 = vpop.f32.mrb[12].mxu0 }
 0x1ee   :  { %v1561_v39 = vpop.f32.mrb[13].mxu0 }
 0x1ef   :  { %v1562_v40 = vadd.f32 %v1561_v39, %v1560_v37  ;;  %v1563_v41 = vpop.f32.mrb[14].mxu0 }
 0x1f0   :  { %v1564_v43 = vpop.f32.mrb[15].mxu0 }
 0x1f1   :  { %v1101_v44 = vadd.f32 %v1562_v40, %v1061_v36 }
 0x1f3   :  { %v1113_v45 = vadd.f32 %v1471_v42, %v1101_v44 }
 0x1f5   :  { %1792 = vtanh.f32 %v1113_v45 }
 0x1ff   :  { %v1793_v46 = vpop.eup %1792 }
 0x200   :  { %v1117_v47 = vpack.c.bf16 %v1793_v46, %v1793_v46 }
 0x202   :  { %1621 = vmatmul.mubr.bf16.vlgmr.msra.gmra.mrb[12].mxu1 %v1117_v47 }
 0x2d5   :  { %v1223_v53 = vpop.f32.mrb[12].mxu1 }
 0x2d6   :  { %v1224_v54 = vadd.f32 %v1472_v52, %v1223_v53  ;;  %v1622_v55 = vpop.f32.mrb[13].mxu1 }
 0x2d7   :  { %v1226_v56 = vpop.f32.mrb[14].mxu1 }
 0x2d8   :  { %1794 = vtanh.f32 %v1224_v54  ;;  %v1623_v57 = vpop.f32.mrb[15].mxu1 }
 0x2e2   :  { %v1795_v58 = vpop.eup %1794 }
 0x2e3   :  { %v1232_v59 = vpack.c.bf16 %v1795_v58, %v1795_v58 }
 0x2e5   :  { %1641 = vmatmul.mubr.bf16.vlgmr.msra.gmra.mrb[16].mxu0 %v1232_v59 }
 0x3b8   :  { %v1338_v60 = vpop.f32.mrb[16].mxu0 }
 0x3b9   :  { %v1339_v61 = vadd.f32 %v1481_v38, %v1338_v60  ;;  %v1642_v62 = vpop.f32.mrb[17].mxu0 }
 0x3ba   :  { %v1341_v63 = vpop.f32.mrb[18].mxu0 }
 0x3bb   :  { %v1490_v0 = vmul.f32 -1.442695, %v1339_v61  ;;  %v1643_v1 = vpop.f32.mrb[19].mxu0 }
 0x3bd   :  { %1796 = vpow2.f32 %v1490_v0 }
 0x3c7   :  { %v1797_v2 = vpop.eup %1796 }
 0x3c8   :  { %v1347_v3 = vadd.f32 1.0, %v1797_v2 }
 0x3ca   :  { %1798 = vrcp.f32 %v1347_v3 }
 0x3d4   :  { %v1799_v4 = vpop.eup %1798 }
 0x3d5   :  { %1350 = vst [vmem:[%s2300_s10] sm:$0xff] %v1799_v4 }

</bundles_post_ra>
